<compile_context>
chip_gen: v5e
topology: v5e:2x2
jax: 0.10.0
libtpu: 0.0.40
codegen_flags: <defaults>
</compile_context>

<pallas_src>
import functools

import jax
import jax.numpy as jnp
from jax.experimental import pallas as pl
from jax.experimental.pallas import tpu as pltpu


_MXU_MIN_CHANNELS = 32  # crossover where a padded MXU matmul beats the unrolled VPU path


def _vmem_limit_bytes():
    """Generation-aware scoped-VMEM limit (v5e/v6e: 128 MiB/TC, v7x: 64 MiB/TC)."""
    cap = 64 * 1024 * 1024  # conservative fallback == v7x physical per-TC
    try:
        info = pltpu.get_tpu_info()
        cap = getattr(info, "vmem_capacity_bytes", cap) or cap
    except Exception:
        pass
    return int(cap * 0.75)  # ~48 MiB on v7x, ~96 MiB on v5e/v6e


def _pick_tile(hw, c, vmem_limit):
    """VMEM-budget-aware HW tile: MiB-scale blocks, multiple of 128 lanes."""
    if hw <= 128:
        return hw  # block == full array dim is always legal
    # Phase 2 keeps ~6 tile-sized f32 blocks live (x, t, out; each double-buffered),
    # plus weights / channel vectors / compiler scratch -> leave ~50% headroom.
    budget_lanes = (vmem_limit // 2) // (6 * c * 4)
    tile = min(hw, max(budget_lanes, 128))
    return max((tile // 128) * 128, 128)


def _conv1x1(w, t, use_mxu):
    """y[co, p] = sum_ci w[co, ci] * t[ci, p].  w: (C, C) f32, t: (C, TILE) f32."""
    if use_mxu:
        # bf16 operands, f32 accumulate: ~3-4x MXU throughput; BN renormalizes y so
        # the accuracy impact is negligible.
        return jnp.dot(w.astype(jnp.bfloat16), t.astype(jnp.bfloat16),
                       preferred_element_type=jnp.float32)
    # Small-C path: unrolled VPU FMAs (outer products), no MXU, no padded contraction.
    # TODO(synk): w could be fed via SMEM scalars to drop the per-iter column slice;
    # kept in VMEM since the VPU has slack at small C.
    C = w.shape[0]
    y = w[:, 0:1] * t[0:1, :]
    for ci in range(1, C):
        y = y + w[:, ci:ci + 1] * t[ci:ci + 1, :]
    return y


def _stats_kernel(t_ref, w_ref, sum_ref, ssq_ref, *, use_mxu, hw, tile):
    # t_ref: (C, TILE)  w_ref: (C, C)
    # sum_ref/ssq_ref: (C, 1) per-N partial accumulators, resident across the j axis.
    j = pl.program_id(1)

    @pl.when(j == 0)
    def _():
        sum_ref[...] = jnp.zeros_like(sum_ref)
        ssq_ref[...] = jnp.zeros_like(ssq_ref)

    t = t_ref[...].astype(jnp.float32)
    w = w_ref[...].astype(jnp.float32)
    y = _conv1x1(w, t, use_mxu)                              # (C, TILE) f32

    if hw % tile != 0:
        # Ragged last block: mask padded lanes so they don't corrupt the statistics.
        lane = jax.lax.broadcasted_iota(jnp.int32, y.shape, 1)
        valid = (j * tile + lane) < hw
        y = jnp.where(valid, y, 0.0)

    # Single pass: sum and sum-of-squares (mean/var finalized once outside).
    sum_ref[...] += jnp.sum(y, axis=1, keepdims=True)
    ssq_ref[...] += jnp.sum(y * y, axis=1, keepdims=True)


def _apply_kernel(x_ref, t_ref, w_ref, scale_ref, shift_ref, o_ref, *,
                  threshold, use_mxu):
    # x_ref/t_ref/o_ref: (C, TILE)  w_ref: (C, C)  scale_ref/shift_ref: (C, 1)
    t = t_ref[...].astype(jnp.float32)
    w = w_ref[...].astype(jnp.float32)
    y = _conv1x1(w, t, use_mxu)                              # (C, TILE) f32

    # Folded BatchNorm affine: y_hat = (y - mean) * rstd * gamma + beta = y*scale + shift
    y_hat = y * scale_ref[...] + shift_ref[...]

    # ThresholdedReLU: x if x > thr else 0
    y_thr = jnp.where(y_hat > threshold, y_hat, 0.0)

    # residual add, lane-dense store (OOB lanes of a ragged last block are dropped)
    o_ref[...] = (x_ref[...].astype(jnp.float32) + y_thr).astype(o_ref.dtype)


def add_threshold(x, threshold_map, conv_w, bn_gamma, bn_beta,
                  threshold: float = 0.1, eps: float = 1e-5):
    """x, threshold_map: NCHW. conv_w: (C, C, 1, 1). bn_gamma/bn_beta: (C,)."""
    N, C, H, W = x.shape
    HW = H * W
    P = N * HW
    vmem_limit = _vmem_limit_bytes()
    tile = _pick_tile(HW, C, vmem_limit)
    n_tiles = pl.cdiv(HW, tile)
    use_mxu = C >= _MXU_MIN_CHANNELS

    # NCHW -> (N, C, H*W): contiguous reshape, no HBM copy (unlike a transpose).
    x3 = x.reshape(N, C, HW)
    t3 = threshold_map.reshape(N, C, HW)
    w2 = conv_w.reshape(C, C).astype(jnp.float32)

    tile_spec = pl.BlockSpec((None, C, tile), lambda n, j: (n, 0, j))
    wmat_spec = pl.BlockSpec((C, C), lambda n, j: (0, 0))        # resident across grid
    chan_spec = pl.BlockSpec((C, 1), lambda n, j: (0, 0))        # resident across grid
    stat_spec = pl.BlockSpec((None, C, 1), lambda n, j: (n, 0, 0))  # per-N partials

    # ---- phase 1: per-channel sum / sum-of-squares of y = conv1x1(threshold_map) ----
    # Per-N partial accumulators let the N axis run "parallel" (both TCs on v7x).
    sums_p, ssqs_p = pl.pallas_call(
        functools.partial(_stats_kernel, use_mxu=use_mxu, hw=HW, tile=tile),
        out_shape=(jax.ShapeDtypeStruct((N, C, 1), jnp.float32),
                   jax.ShapeDtypeStruct((N, C, 1), jnp.float32)),
        grid=(N, n_tiles),
        in_specs=[tile_spec, wmat_spec],
        out_specs=(stat_spec, stat_spec),
        compiler_params=pltpu.CompilerParams(
            dimension_semantics=("parallel", "arbitrary"),
            vmem_limit_bytes=vmem_limit),
    )(t3, w2)

    # ---- finalize BN stats (tiny (C,1) math, once) ----
    sums = jnp.sum(sums_p, axis=0)                   # (C, 1)
    ssqs = jnp.sum(ssqs_p, axis=0)                   # (C, 1)
    mean = sums / P
    var = jnp.maximum(ssqs / P - mean * mean, 0.0)   # biased (training-mode) variance
    rstd = jax.lax.rsqrt(var + eps)
    scale = bn_gamma.reshape(C, 1).astype(jnp.float32) * rstd
    shift = bn_beta.reshape(C, 1).astype(jnp.float32) - mean * scale
    # TODO(synk): PyTorch training-mode BN also updates running_mean/running_var
    # buffers; only the forward output is reproduced here.

    # ---- phase 2: recompute conv per tile, apply BN affine + threshold + residual ----
    out3 = pl.pallas_call(
        functools.partial(_apply_kernel, threshold=threshold, use_mxu=use_mxu),
        out_shape=jax.ShapeDtypeStruct((N, C, HW), x.dtype),
        grid=(N, n_tiles),
        in_specs=[tile_spec, tile_spec, wmat_spec, chan_spec, chan_spec],
        out_specs=tile_spec,
        compiler_params=pltpu.CompilerParams(
            dimension_semantics=("parallel", "parallel"),
            vmem_limit_bytes=vmem_limit),
    )(x3, t3, w2, scale, shift)

    return out3.reshape(N, C, H, W)


def _reference(x, threshold_map, conv_w, bn_gamma, bn_beta, threshold=0.1, eps=1e-5):
    # pure-JAX reference mirroring the PyTorch forward (training-mode BN)
    C = x.shape[1]
    y = jnp.einsum('nchw,oc->nohw', threshold_map, conv_w.reshape(C, C))
    mean = jnp.mean(y, axis=(0, 2, 3), keepdims=True)
    var = jnp.mean((y - mean) ** 2, axis=(0, 2, 3), keepdims=True)
    y_hat = (y - mean) / jnp.sqrt(var + eps)
    y_hat = y_hat * bn_gamma.reshape(1, C, 1, 1) + bn_beta.reshape(1, C, 1, 1)
    y_thr = jnp.where(y_hat > threshold, y_hat, 0.0)
    return x + y_thr


if __name__ == "__main__":
    N, C, H, W = 2, 4, 16, 16
    key = jax.random.PRNGKey(0)
    k1, k2, k3, k4, k5 = jax.random.split(key, 5)

    x = jax.random.normal(k1, (N, C, H, W), dtype=jnp.float32)
    threshold_map = jax.random.normal(k2, (N, C, H, W), dtype=jnp.float32)
    # Conv2d(in=C, out=C, k=1, bias=False) weight: (C, C, 1, 1)
    conv_w = jax.random.normal(k3, (C, C, 1, 1), dtype=jnp.float32) * 0.5
    # BatchNorm2d affine params (deterministic, non-trivial)
    bn_gamma = 1.0 + 0.1 * jax.random.normal(k4, (C,), dtype=jnp.float32)
    bn_beta = 0.1 * jax.random.normal(k5, (C,), dtype=jnp.float32)

    out = add_threshold(x, threshold_map, conv_w, bn_gamma, bn_beta, threshold=0.1)
    out = jax.block_until_ready(out)

    ref = _reference(x, threshold_map, conv_w, bn_gamma, bn_beta, threshold=0.1)
    assert out.shape == (N, C, H, W)
    assert jnp.allclose(out, ref, atol=1e-4, rtol=1e-4), "mismatch vs reference"

    print("KERNEL_OK")
</pallas_src>

<mosaic_0001>
module attributes {stable_mosaic.version = 11 : i64} {
  func.func @_stats_kernel(%arg0: i32, %arg1: i32, %arg2: memref<1x4x256xf32, #tpu.memory_space<vmem>>, %arg3: memref<4x4xf32, #tpu.memory_space<vmem>>, %arg4: memref<1x4x1xf32, #tpu.memory_space<vmem>>, %arg5: memref<1x4x1xf32, #tpu.memory_space<vmem>>) attributes {dimension_semantics = [#tpu.dimension_semantics<parallel>, #tpu.dimension_semantics<arbitrary>], iteration_bounds = array<i64: 2, 1>, scalar_prefetch = 0 : i64, scratch_operands = 0 : i64, tpu.core_type = #tpu.core_type<tc>, window_params = [{transform_indices = @transform_0, window_bounds = array<i64: 1, 4, 256>}, {pipeline_mode = #tpu.pipeline_mode<synchronous>, transform_indices = @transform_1, window_bounds = array<i64: 4, 4>}, {transform_indices = @transform_2, window_bounds = array<i64: 1, 4, 1>}, {transform_indices = @transform_3, window_bounds = array<i64: 1, 4, 1>}]} {
    %c0_i32 = arith.constant 0 : i32
    %0 = arith.cmpi eq, %arg1, %c0_i32 : i32
    %1 = arith.extui %0 : i1 to i32
    %c0_i32_0 = arith.constant 0 : i32
    %2 = arith.cmpi ne, %1, %c0_i32_0 : i32
    scf.if %2 {
      %cst_18 = arith.constant 0.000000e+00 : f32
      %46 = vector.broadcast %cst_18 : f32 to vector<4x1xf32>
      %c0_19 = arith.constant 0 : index
      %c0_20 = arith.constant 0 : index
      %c0_21 = arith.constant 0 : index
      %47 = vector.load %arg4[%c0_19, %c0_20, %c0_21] : memref<1x4x1xf32, #tpu.memory_space<vmem>>, vector<1x4x1xf32>
      %48 = vector.shape_cast %47 : vector<1x4x1xf32> to vector<4x1xf32>
      %49 = vector.shape_cast %46 : vector<4x1xf32> to vector<1x4x1xf32>
      tpu.vector_store %arg4[%c0_19, %c0_20, %c0_21], %49 {strides = array<i32>} : memref<1x4x1xf32, #tpu.memory_space<vmem>>, vector<1x4x1xf32>,
      %cst_22 = arith.constant 0.000000e+00 : f32
      %50 = vector.broadcast %cst_22 : f32 to vector<4x1xf32>
      %c0_23 = arith.constant 0 : index
      %c0_24 = arith.constant 0 : index
      %c0_25 = arith.constant 0 : index
      %51 = vector.load %arg5[%c0_23, %c0_24, %c0_25] : memref<1x4x1xf32, #tpu.memory_space<vmem>>, vector<1x4x1xf32>
      %52 = vector.shape_cast %51 : vector<1x4x1xf32> to vector<4x1xf32>
      %53 = vector.shape_cast %50 : vector<4x1xf32> to vector<1x4x1xf32>
      tpu.vector_store %arg5[%c0_23, %c0_24, %c0_25], %53 {strides = array<i32>} : memref<1x4x1xf32, #tpu.memory_space<vmem>>, vector<1x4x1xf32>,
    } else {
    }
    %c0 = arith.constant 0 : index
    %c0_1 = arith.constant 0 : index
    %c0_2 = arith.constant 0 : index
    %3 = vector.load %arg2[%c0, %c0_1, %c0_2] : memref<1x4x256xf32, #tpu.memory_space<vmem>>, vector<1x4x256xf32>
    %4 = vector.shape_cast %3 : vector<1x4x256xf32> to vector<4x256xf32>
    %c0_3 = arith.constant 0 : index
    %c0_4 = arith.constant 0 : index
    %5 = vector.load %arg3[%c0_3, %c0_4] : memref<4x4xf32, #tpu.memory_space<vmem>>, vector<4x4xf32>
    %6 = vector.extract_strided_slice %5 {offsets = [0, 0], sizes = [4, 1], strides = [1, 1]} : vector<4x4xf32> to vector<4x1xf32>
    %7 = vector.extract_strided_slice %4 {offsets = [0, 0], sizes = [1, 256], strides = [1, 1]} : vector<4x256xf32> to vector<1x256xf32>
    %8 = vector.broadcast %6 : vector<4x1xf32> to vector<4x256xf32>
    %9 = vector.broadcast %7 : vector<1x256xf32> to vector<4x256xf32>
    %10 = arith.mulf %8, %9 : vector<4x256xf32>
    %11 = vector.extract_strided_slice %5 {offsets = [0, 1], sizes = [4, 1], strides = [1, 1]} : vector<4x4xf32> to vector<4x1xf32>
    %12 = vector.extract_strided_slice %4 {offsets = [1, 0], sizes = [1, 256], strides = [1, 1]} : vector<4x256xf32> to vector<1x256xf32>
    %13 = vector.broadcast %11 : vector<4x1xf32> to vector<4x256xf32>
    %14 = vector.broadcast %12 : vector<1x256xf32> to vector<4x256xf32>
    %15 = arith.mulf %13, %14 : vector<4x256xf32>
    %16 = arith.addf %10, %15 : vector<4x256xf32>
    %17 = vector.extract_strided_slice %5 {offsets = [0, 2], sizes = [4, 1], strides = [1, 1]} : vector<4x4xf32> to vector<4x1xf32>
    %18 = vector.extract_strided_slice %4 {offsets = [2, 0], sizes = [1, 256], strides = [1, 1]} : vector<4x256xf32> to vector<1x256xf32>
    %19 = vector.broadcast %17 : vector<4x1xf32> to vector<4x256xf32>
    %20 = vector.broadcast %18 : vector<1x256xf32> to vector<4x256xf32>
    %21 = arith.mulf %19, %20 : vector<4x256xf32>
    %22 = arith.addf %16, %21 : vector<4x256xf32>
    %23 = vector.extract_strided_slice %5 {offsets = [0, 3], sizes = [4, 1], strides = [1, 1]} : vector<4x4xf32> to vector<4x1xf32>
    %24 = vector.extract_strided_slice %4 {offsets = [3, 0], sizes = [1, 256], strides = [1, 1]} : vector<4x256xf32> to vector<1x256xf32>
    %25 = vector.broadcast %23 : vector<4x1xf32> to vector<4x256xf32>
    %26 = vector.broadcast %24 : vector<1x256xf32> to vector<4x256xf32>
    %27 = arith.mulf %25, %26 : vector<4x256xf32>
    %28 = arith.addf %22, %27 : vector<4x256xf32>
    %c0_5 = arith.constant 0 : index
    %c0_6 = arith.constant 0 : index
    %c0_7 = arith.constant 0 : index
    %29 = vector.load %arg4[%c0_5, %c0_6, %c0_7] : memref<1x4x1xf32, #tpu.memory_space<vmem>>, vector<1x4x1xf32>
    %30 = vector.shape_cast %29 : vector<1x4x1xf32> to vector<4x1xf32>
    %cst = arith.constant dense<0.000000e+00> : vector<4xf32>
    %31 = vector.multi_reduction <add>, %28, %cst [1] : vector<4x256xf32> to vector<4xf32>
    %32 = vector.shape_cast %31 : vector<4xf32> to vector<4x1xf32>
    %33 = arith.addf %30, %32 : vector<4x1xf32>
    %c0_8 = arith.constant 0 : index
    %c0_9 = arith.constant 0 : index
    %c0_10 = arith.constant 0 : index
    %34 = vector.load %arg4[%c0_8, %c0_9, %c0_10] : memref<1x4x1xf32, #tpu.memory_space<vmem>>, vector<1x4x1xf32>
    %35 = vector.shape_cast %34 : vector<1x4x1xf32> to vector<4x1xf32>
    %36 = vector.shape_cast %33 : vector<4x1xf32> to vector<1x4x1xf32>
    tpu.vector_store %arg4[%c0_8, %c0_9, %c0_10], %36 {strides = array<i32>} : memref<1x4x1xf32, #tpu.memory_space<vmem>>, vector<1x4x1xf32>,
    %c0_11 = arith.constant 0 : index
    %c0_12 = arith.constant 0 : index
    %c0_13 = arith.constant 0 : index
    %37 = vector.load %arg5[%c0_11, %c0_12, %c0_13] : memref<1x4x1xf32, #tpu.memory_space<vmem>>, vector<1x4x1xf32>
    %38 = vector.shape_cast %37 : vector<1x4x1xf32> to vector<4x1xf32>
    %39 = arith.mulf %28, %28 : vector<4x256xf32>
    %cst_14 = arith.constant dense<0.000000e+00> : vector<4xf32>
    %40 = vector.multi_reduction <add>, %39, %cst_14 [1] : vector<4x256xf32> to vector<4xf32>
    %41 = vector.shape_cast %40 : vector<4xf32> to vector<4x1xf32>
    %42 = arith.addf %38, %41 : vector<4x1xf32>
    %c0_15 = arith.constant 0 : index
    %c0_16 = arith.constant 0 : index
    %c0_17 = arith.constant 0 : index
    %43 = vector.load %arg5[%c0_15, %c0_16, %c0_17] : memref<1x4x1xf32, #tpu.memory_space<vmem>>, vector<1x4x1xf32>
    %44 = vector.shape_cast %43 : vector<1x4x1xf32> to vector<4x1xf32>
    %45 = vector.shape_cast %42 : vector<4x1xf32> to vector<1x4x1xf32>
    tpu.vector_store %arg5[%c0_15, %c0_16, %c0_17], %45 {strides = array<i32>} : memref<1x4x1xf32, #tpu.memory_space<vmem>>, vector<1x4x1xf32>,
    return
  }
  func.func @transform_0(%arg0: i32, %arg1: i32) -> (i32, i32, i32) {
    %c0_i32 = arith.constant 0 : i32
    %c0_i32_0 = arith.constant 0 : i32
    return %arg0, %c0_i32, %arg1 : i32, i32, i32
  }
  func.func @transform_1(%arg0: i32, %arg1: i32) -> (i32, i32) {
    %c0_i32 = arith.constant 0 : i32
    %c0_i32_0 = arith.constant 0 : i32
    %c0_i32_1 = arith.constant 0 : i32
    return %c0_i32, %c0_i32_0 : i32, i32
  }
  func.func @transform_2(%arg0: i32, %arg1: i32) -> (i32, i32, i32) {
    %c0_i32 = arith.constant 0 : i32
    %c0_i32_0 = arith.constant 0 : i32
    %c0_i32_1 = arith.constant 0 : i32
    return %arg0, %c0_i32, %c0_i32_0 : i32, i32, i32
  }
  func.func @transform_3(%arg0: i32, %arg1: i32) -> (i32, i32, i32) {
    %c0_i32 = arith.constant 0 : i32
    %c0_i32_0 = arith.constant 0 : i32
    %c0_i32_1 = arith.constant 0 : i32
    return %arg0, %c0_i32, %c0_i32_0 : i32, i32, i32
  }
}

</mosaic_0001>

<bundles_post_ra>
// kernel: tpu_custom_call.1
= control target key start
LH: loop header
LB: loop body
LE: loop exit
PB: predicated region body
PF: predicated region fallthrough
CT: control target
= control target key end

     0   :  { %9 = vsyncpa [#allocation3], 0  ;;  %s796_s0 = inlined_call_operand.hbm [shape: f32[2,4,256], index: 0, kind: input, shape index: {}]   ;;  %s797_s1 = inlined_call_operand.hbm [shape: f32[4,4], index: 1, kind: input, shape index: {}]   ;;  %s798_s2 = inlined_call_operand.vmem [shape: f32[2,4,1], index: 2, kind: output, shape index: {0}]   ;;  %s799_s3 = inlined_call_operand.vmem [shape: f32[2,4,1], index: 3, kind: output, shape index: {1}]  }
   0x1   :  { %11 = vsyncpa [#allocation3 + $0x1], 0 }
   0x2   :  { %12 = vsyncpa [#allocation5], 0  ;;  %s668_s12 = smov 0   ;;  %s670_s13 = smov 0  }
   0x3   :  { %s672_s14 = smov 0   ;;  %s674_s15 = smov 0  }
   0x4   :  { %s676_s16 = smov 0   ;;  %s678_s17 = smov 0  }
   0x5 LB: > { %s434_s18 = sadd.s32 4294967295, %s640_s17   ;;  %p52_p0 = scmp.ne.s32.totalorder %s624_s13, %s620_s12  ;;  %s640_s17 = sphi %s678_s17, %s18_s17   ;;  %s636_s16 = sphi %s676_s16, %s808_s16   ;;  %s632_s15 = sphi %s674_s15, %s807_s15   ;;  %s628_s14 = sphi %s672_s14, %s806_s14   ;;  %s624_s13 = sphi %s670_s13, %s805_s13   ;;  %s620_s12 = sphi %s668_s12, %s804_s12  }
   0x6   : > { %p698_p1 = scmp.eq.s32.totalorder %s434_s18, 0  ;;  %p436_p2 = scmp.ge.s32.totalorder %s640_s17, 1 }
   0x7   : > { %p136_p3 = scmp.lt.s32.totalorder %s640_s17, 3  ;;  %s148_s23 = sshll.u32 %s797_s1, 4  ;;  %s149_s23 = int_to_ptr.hbm [resolvable:$true] %s148_s23 }
   0x8   : > { %p706_p4 = por %p698_p1, %p52_p0  ;;  %s642_s25 = smov [#allocation4]  }
   0x9   : > { %p713_p5 = pnand %p436_p2, %p136_p3  ;;  %s150_s26 = sshll.u32 %s642_s25, 4  ;;  %s151_s26 = int_to_ptr.vmem [resolvable:$true] %s150_s26 }
   0xa   : > { %s30_s27 = sadd.s32 1, %s636_s16  ;;  %p46_p9 = scmp.ne.s32.totalorder %s628_s14, %s624_s13 }
   0xb   : > { %p456_p6 = pneg %p713_p5  ;;  %p32_p8 = scmp.ge.s32.totalorder %s30_s27, 2 }
   0xc   : > { %p47_p10 = scmp.eq.s32.totalorder %s640_s17, 0  ;;  %s39_s28 = sadd.s32 1, %s628_s14 }
   0xd   : > { %p457_p7 = pnand %p456_p6, %p698_p1  ;;  %s810_s27 = smov (%p32_p8, %s30_s27), 0 }
   0xe   : > { %p728_p11 = por %p47_p10, %p46_p9  ;;  %s34_s30 = ssub.s32 %s636_s16, %s810_s27 }
   0xf   : > { %459 = dma.hbm_to_vmem [thread:$0]  (!%p457_p7), %s149_s23, 64, %s151_s26, [#allocation5]  }
  0x10   : > { %s161_s4 = sand.u32 1, %s628_s14   ;;  %p37_p12 = scmp.eq.s32.totalorder %s34_s30, 0 }
  0x11   : > { %p465_p13 = scmp.lt.s32.totalorder %s640_s17, 2  ;;  %s439_s5 = sshll.u32 %s161_s4, 3 }
  0x12   : > { %s449_s6 = sshll.u32 %s636_s16, 3  ;;  %s165_s12 = scalar_lea.vmem [#allocation2], %s439_s5 }
  0x13   : > { %s738_s7 = scalar_select %p37_p12, %s628_s14, %s39_s28  }
  0x14   : > { %s172_s10 = scalar_lea.hbm %s796_s0, %s449_s6  ;;  %s176_s18 = sshll.u32 %s165_s12, 4  ;;  %s177_s18 = int_to_ptr.vmem [resolvable:$true] %s176_s18 }
  0x15   : > { %s174_s11 = sshll.u32 %s172_s10, 4  ;;  %p461_p0 = pnand %p465_p13, %p728_p11  ;;  %s175_s11 = int_to_ptr.hbm [resolvable:$true] %s174_s11 }
  0x16   : > { %s162_s21 = scalar_lea.sflag [#allocation3], %s161_s4  ;;  %185 = sbr.rel (%p713_p5) target bundleno = 294 (0x126), region = 28 }
  0x17   : > { %463 = dma.hbm_to_vmem [thread:$0]  (!%p461_p0), %s175_s11, 128, %s177_s18, %s162_s21  }
  0x18   : > { %s187_s22 = sand.u32 (!%p713_p5), 1, %s624_s13  }
  0x19   : > { %s443_s23 = sshll.u32 (!%p713_p5), %s187_s22, 3  ;;  %s188_s25 = scalar_lea.sflag (!%p713_p5), [#allocation3], %s187_s22 }
  0x1a   : > { %s191_s26 = scalar_lea.vmem (!%p713_p5), [#allocation2], %s443_s23 }
  0x1b   : > { %611 = dma.done.wait (%p706_p4), %s188_s25, 128  }
  0x1c   : > { %613 = vsyncadd (%p706_p4), %s188_s25, 4294967168 }
  0x1d   : > { %615 = dma.done.wait (%p698_p1), [#allocation5], 64  }
  0x1e   : > { %617 = vsyncadd (%p698_p1), [#allocation5], 4294967232  ;;  %v643_v0 = vmov 0   ;;  %v644_v1 = vmov 2   ;;  %v240_v2 = vld [vmem:[#allocation4] sm:$0xf] }
  0x1f   : > { %521 = vset.pattern.permute.xlu0 %v643_v0  ;;  %523 = vset.pattern.permute.xlu1 %v644_v1  ;;  %v645_v3 = vmov 1   ;;  %v646_v4 = vmov 3   ;;  %p224_p2 = scmp.lt.s32.totalorder %s632_s15, 1  ;;  %vm236_vm0 = vcmask 3072   ;;  %v647_v5 = vmov 0.0   ;;  %v239_v6 = vld [vmem:[%s191_s26] sm:$0xff] }
  0x20   : > { %243 = vperm.xlu0 %521, %v240_v2   ;;  %270 = vperm.xlu1 %523, %v240_v2   ;;  %v247_v9 = vperm.slane %v239_v6, 0  ;;  %v248_v10 = vperm.slane %v239_v6, 4  ;;  %v259_v11 = vperm.slane %v239_v6, 1  ;;  %v260_v12 = vperm.slane %v239_v6, 5 }
  0x21   : > { %s812_s15 = smov (!%p224_p2, %s632_s15), 1  ;;  %v273_v13 = vperm.slane %v239_v6, 2  ;;  %v274_v14 = vperm.slane %v239_v6, 6  ;;  %v287_v15 = vperm.slane %v239_v6, 3  ;;  %v288_v16 = vperm.slane %v239_v6, 7 }
  0x22   : > { %s445_s19 = sshll.u32 %s812_s15, 2  ;;  %v251_v17 = vperm.slane %v247_v9, 0  ;;  %v252_v18 = vperm.slane %v248_v10, 0  ;;  %v263_v19 = vperm.slane %v259_v11, 1  ;;  %v264_v20 = vperm.slane %v260_v12, 1 }
  0x23   : > { %s761_s28 = scalar_lea.vmem %s798_s2, %s445_s19  ;;  %v277_v21 = vperm.slane %v273_v13, 2  ;;  %v278_v22 = vperm.slane %v274_v14, 2  ;;  %v291_v23 = vperm.slane %v287_v15, 3  ;;  %v292_v24 = vperm.slane %v288_v16, 3  ;;  %s768_s30 = scalar_lea.vmem %s799_s3, %s445_s19 }
  0x24   : > { %237 = vst.msk [vmem:[%s761_s28] sm:$0xf] %vm236_vm0, %v647_v5  ;;  %vm298_vm1 = vcmask 1043456  }
  0x25   : > { %238 = vst.msk [vmem:[%s768_s30] sm:$0xf] %vm236_vm0, %v647_v5 }
  0x28   : > { %522 = vset.pattern.permute.xlu0 %v645_v3  ;;  %524 = vset.pattern.permute.xlu1 %v646_v4 }
  0x29   : > { %256 = vperm.xlu0 %522, %v240_v2   ;;  %284 = vperm.xlu1 %524, %v240_v2  }
  0x2b   : > { %v297_v49 = vld [vmem:[%s761_s28] sm:$0xf] }
  0x2c   : > { %v307_v52 = vld [vmem:[%s768_s30] sm:$0xf] }
  0x31   : > { %525 = vset.pattern.permute.xlu0 %v646_v4 }
  0x92   : > { %v244_v7 = vpop.permute.xlu0 %243  ;;  %v271_v8 = vpop.permute.xlu1 %270 }
  0x93   : > { %v253_v27 = vmul.f32 %v251_v17, %v244_v7  ;;  %v254_v28 = vmul.f32 %v252_v18, %v244_v7  ;;  %v279_v31 = vmul.f32 %v277_v21, %v271_v8  ;;  %v280_v32 = vmul.f32 %v278_v22, %v271_v8 }
  0x9b   : > { %v257_v25 = vpop.permute.xlu0 %256  ;;  %v285_v26 = vpop.permute.xlu1 %284 }
  0x9c   : > { %v265_v29 = vmul.f32 %v263_v19, %v257_v25  ;;  %v266_v30 = vmul.f32 %v264_v20, %v257_v25  ;;  %v293_v35 = vmul.f32 %v291_v23, %v285_v26  ;;  %v294_v36 = vmul.f32 %v292_v24, %v285_v26 }
  0x9e   : > { %v267_v33 = vadd.f32 %v265_v29, %v253_v27  ;;  %v268_v34 = vadd.f32 %v266_v30, %v254_v28 }
  0xa0   : > { %v281_v37 = vadd.f32 %v279_v31, %v267_v33  ;;  %v282_v38 = vadd.f32 %v280_v32, %v268_v34 }
  0xa2   : > { %v295_v39 = vadd.f32 %v293_v35, %v281_v37  ;;  %v296_v40 = vadd.f32 %v294_v36, %v282_v38 }
  0xa4   : > { %v299_v41 = vsel %vm298_vm1, %v295_v39, 0.0  ;;  %v300_v42 = vsel %vm298_vm1, %v296_v40, 0.0  ;;  %v308_v44 = vmul.f32 %v295_v39, %v295_v39  ;;  %v309_v45 = vmul.f32 %v296_v40, %v296_v40 }
  0xa5   : > { %v301_v43 = vadd.f32 %v300_v42, %v299_v41 }
  0xa6   : > { %v310_v46 = vsel %vm298_vm1, %v308_v44, 0.0  ;;  %v311_v47 = vsel %vm298_vm1, %v309_v45, 0.0 }
  0xa7   : > { %302 = vadd.xlane.f32.xlu2 %v301_v43  ;;  %v312_v48 = vadd.f32 %v311_v47, %v310_v46 }
  0xaf   : > { %313 = vadd.xlane.f32.xlu2 %v312_v48 }
 0x11a   : > { %v303_v50 = vpop.xlane.xlu2 %302 }
 0x11b   : > { %v304_v51 = vadd.f32 %v303_v50, %v297_v49 }
 0x11d   : > { %306 = vst.msk [vmem:[%s761_s28] sm:$0xf] %vm236_vm0, %v304_v51 }
 0x122   : > { %v314_v53 = vpop.xlane.xlu2 %313 }
 0x123   : > { %v315_v54 = vadd.f32 %v314_v53, %v307_v52 }
 0x125   : > { %316 = vst.msk [vmem:[%s768_s30] sm:$0xf] %vm236_vm0, %v315_v54 }
 0x126 PF: > { %s18_s17 = sadd.s32 1, %s640_s17   ;;  %s804_s12 = smov %s624_s13 }
 0x127   : > { %p15_p1 = scmp.ge.s32.totalorder %s18_s17, 4   ;;  %s805_s13 = smov %s628_s14 }
 0x128   : > { %s806_s14 = smov %s738_s7  ;;  %s807_s15 = smov %s636_s16 }
 0x129   : > { %s808_s16 = smov %s810_s27  ;;  %17 = sbr.rel (!%p15_p1) target bundleno = 5 (0x5), region = 88 }
 0x12e   :  { %350 = vsyncpa [#allocation3], 1 }
 0x12f   :  { %352 = vsyncpa [#allocation3 + $0x1], 1 }
 0x130   :  { %353 = vsyncpa [#allocation5], 1 }

</bundles_post_ra>
